<compile_context>
chip_gen: v7x
topology: tpu7x:2x2x1
jax: 0.10.0
libtpu: 0.0.40
codegen_flags: <defaults>
</compile_context>

<pallas_src>
import jax
import jax.numpy as jnp
from jax.experimental import pallas as pl
from jax.experimental.pallas import tpu as pltpu


def qnet_kernel(x_ref, w1_ref, b1_ref, w2_ref, b2_ref, w3_ref, b3_ref, o_ref):
    """Fused 3-layer MLP on one (TB, dim_states) batch tile."""
    cdt = w1_ref.dtype  # MXU input dtype (bf16 by default)
    # In-kernel cast of x (free VPU work under DMA/MXU slack).
    x = x_ref[...].astype(cdt)
    # fc1 + ReLU (accumulate in f32, activation math in f32, then pack to bf16)
    h1 = jnp.dot(x, w1_ref[...], preferred_element_type=jnp.float32)
    h1 = jnp.maximum(h1 + b1_ref[...], 0.0).astype(cdt)
    # fc2 + ReLU
    h2 = jnp.dot(h1, w2_ref[...], preferred_element_type=jnp.float32)
    h2 = jnp.maximum(h2 + b2_ref[...], 0.0).astype(cdt)
    # fc3 (no activation) -- unpadded, f32 output (keeps argmax precision)
    out = jnp.dot(h2, w3_ref[...], preferred_element_type=jnp.float32)
    o_ref[...] = (out + b3_ref[...]).astype(o_ref.dtype)


def prepare_params(params, compute_dtype=jnp.bfloat16):
    """One-time cast of weights to the MXU dtype and biases to f32 (cached)."""
    return {
        "w1": params["w1"].astype(compute_dtype),
        "w2": params["w2"].astype(compute_dtype),
        "w3": params["w3"].astype(compute_dtype),
        "b1": params["b1"].astype(jnp.float32),
        "b2": params["b2"].astype(jnp.float32),
        "b3": params["b3"].astype(jnp.float32),
    }


def _min_grid_for_device():
    """v7x has 2 TensorCores per chip -> keep grid >= 2 so both get work."""
    try:
        kind = jax.devices()[0].device_kind.lower()
    except Exception:
        return 1
    return 2 if "v7" in kind else 1


def _pick_tile(B, block_b, min_grid):
    """Largest tile <= block_b that still yields grid >= min_grid, rounded to 8 rows."""
    target = -(-B // max(min_grid, 1))        # ceil(B / min_grid)
    target = max(8, -(-target // 8) * 8)       # round up to sublane multiple
    tb = min(block_b, target)
    grid_b = -(-B // tb)
    return tb, grid_b


def qnet_forward(x, prepared, *, block_b=4096, small_batch_threshold=32,
                 min_grid=None, out_buffers=None):
    """x: (B, dim_states) float32.  prepared: output of prepare_params()."""
    w1, b1 = prepared["w1"], prepared["b1"]
    w2, b2 = prepared["w2"], prepared["b2"]
    w3, b3 = prepared["w3"], prepared["b3"]
    B, dim_states = x.shape
    dim_actions = w3.shape[1]

    # Tiny-batch fast path (RL action selection): launch overhead dominates,
    # so skip the Pallas call / pad / slice entirely.
    if small_batch_threshold is not None and B <= small_batch_threshold:
        return qnet_reference_prepared(x, prepared)

    if min_grid is None:
        min_grid = _min_grid_for_device()
    tb, grid_b = _pick_tile(B, block_b, min_grid)
    b_pad = grid_b * tb
    if b_pad != B:
        x = jnp.pad(x, ((0, b_pad - B), (0, 0)))

    # Weights/biases: constant block index -> VMEM-resident, DMA'd once.
    resident = lambda shape: pl.BlockSpec(shape, lambda i: (0, 0))

    if out_buffers is not None:
        # Optional deeper output buffering (worth sweeping on v5e only).
        out_spec = pl.BlockSpec((tb, dim_actions), lambda i: (i, 0),
                                pipeline_mode=pl.Buffered(out_buffers))
    else:
        out_spec = pl.BlockSpec((tb, dim_actions), lambda i: (i, 0))

    out_padded = pl.pallas_call(
        qnet_kernel,
        out_shape=jax.ShapeDtypeStruct((b_pad, dim_actions), jnp.float32),
        grid=(grid_b,),
        in_specs=[
            pl.BlockSpec((tb, dim_states), lambda i: (i, 0)),  # x: streamed
            resident(w1.shape), resident(b1.shape),
            resident(w2.shape), resident(b2.shape),
            resident(w3.shape), resident(b3.shape),
        ],
        out_specs=out_spec,
        compiler_params=pltpu.CompilerParams(
            dimension_semantics=("parallel",)),  # 2 TCs on v7x, no-op v5e/v6e
    )(x, w1, b1, w2, b2, w3, b3)

    if b_pad != B:
        out_padded = out_padded[:B]
    return out_padded


def qnet_reference_prepared(x, prepared):
    """Plain-JAX chain with the same dtype path as the kernel (also the fast path)."""
    cdt = prepared["w1"].dtype
    h1 = jnp.maximum(
        jnp.dot(x.astype(cdt), prepared["w1"],
                preferred_element_type=jnp.float32) + prepared["b1"], 0.0
    ).astype(cdt)
    h2 = jnp.maximum(
        jnp.dot(h1, prepared["w2"],
                preferred_element_type=jnp.float32) + prepared["b2"], 0.0
    ).astype(cdt)
    return jnp.dot(h2, prepared["w3"],
                   preferred_element_type=jnp.float32) + prepared["b3"]


def qnet_reference(x, params, compute_dtype=jnp.bfloat16):
    return qnet_reference_prepared(x, prepare_params(params, compute_dtype))


def init_params(key, dim_states, dim_actions, hidden=128):
    """Matches PyTorch nn.Linear shapes/init, stored transposed as (in, out)."""
    ks = jax.random.split(key, 6)

    def lin(kw, kb, fan_in, fan_out):
        bound = 1.0 / jnp.sqrt(fan_in)
        w = jax.random.uniform(kw, (fan_in, fan_out), jnp.float32, -bound, bound)
        b = jax.random.uniform(kb, (1, fan_out), jnp.float32, -bound, bound)
        return w, b

    w1, b1 = lin(ks[0], ks[1], dim_states, hidden)
    w2, b2 = lin(ks[2], ks[3], hidden, hidden)
    w3, b3 = lin(ks[4], ks[5], hidden, dim_actions)
    return {"w1": w1, "b1": b1, "w2": w2, "b2": b2, "w3": w3, "b3": b3}


# TODO(synk): Qnet.sample_action (python `random` epsilon-greedy + .item()) is
# host-side control logic, not a kernel; only forward() is implemented here.

if __name__ == "__main__":
    key = jax.random.PRNGKey(0)
    dim_states = 8
    dim_actions = 4
    batch = 2

    k_params, k_x, k_x2 = jax.random.split(key, 3)
    params = init_params(k_params, dim_states, dim_actions)
    prepared = prepare_params(params)  # cached bf16 weights / f32 biases

    # Small batch forced through the Pallas path (single grid point, 8-row pad).
    x = jax.random.normal(k_x, (batch, dim_states), jnp.float32)
    out = jax.block_until_ready(
        qnet_forward(x, prepared, small_batch_threshold=None))
    ref = qnet_reference(x, params)
    assert out.shape == (batch, dim_actions)
    assert jnp.allclose(out, ref, atol=1e-2, rtol=1e-2)

    # Same small batch through the tiny-batch fast path (no Pallas launch).
    out_fast = jax.block_until_ready(qnet_forward(x, prepared))
    assert jnp.allclose(out_fast, ref, atol=1e-2, rtol=1e-2)

    # Larger batch exercising the multi-tile grid + batch padding path.
    big_batch = 600  # block_b=256 -> tb=256, grid=(3,), padded to 768
    x_big = jax.random.normal(k_x2, (big_batch, dim_states), jnp.float32)
    out_big = jax.block_until_ready(
        qnet_forward(x_big, prepared, block_b=256))
    ref_big = qnet_reference(x_big, params)
    assert out_big.shape == (big_batch, dim_actions)
    assert jnp.allclose(out_big, ref_big, atol=1e-2, rtol=1e-2)

    print("KERNEL_OK")
</pallas_src>

<mosaic_0001>
module attributes {stable_mosaic.version = 11 : i64} {
  func.func @qnet_kernel(%arg0: i32, %arg1: memref<8x8xf32, #tpu.memory_space<vmem>>, %arg2: memref<8x128xbf16, #tpu.memory_space<vmem>>, %arg3: memref<1x128xf32, #tpu.memory_space<vmem>>, %arg4: memref<128x128xbf16, #tpu.memory_space<vmem>>, %arg5: memref<1x128xf32, #tpu.memory_space<vmem>>, %arg6: memref<128x4xbf16, #tpu.memory_space<vmem>>, %arg7: memref<1x4xf32, #tpu.memory_space<vmem>>, %arg8: memref<8x4xf32, #tpu.memory_space<vmem>>) attributes {dimension_semantics = [#tpu.dimension_semantics<parallel>], iteration_bounds = array<i64: 1>, scalar_prefetch = 0 : i64, scratch_operands = 0 : i64, tpu.core_type = #tpu.core_type<tc>, window_params = [{transform_indices = @transform_0, window_bounds = array<i64: 8, 8>}, {pipeline_mode = #tpu.pipeline_mode<synchronous>, transform_indices = @transform_1, window_bounds = array<i64: 8, 128>}, {pipeline_mode = #tpu.pipeline_mode<synchronous>, transform_indices = @transform_2, window_bounds = array<i64: 1, 128>}, {pipeline_mode = #tpu.pipeline_mode<synchronous>, transform_indices = @transform_3, window_bounds = array<i64: 128, 128>}, {pipeline_mode = #tpu.pipeline_mode<synchronous>, transform_indices = @transform_4, window_bounds = array<i64: 1, 128>}, {pipeline_mode = #tpu.pipeline_mode<synchronous>, transform_indices = @transform_5, window_bounds = array<i64: 128, 4>}, {pipeline_mode = #tpu.pipeline_mode<synchronous>, transform_indices = @transform_6, window_bounds = array<i64: 1, 4>}, {transform_indices = @transform_7, window_bounds = array<i64: 8, 4>}]} {
    %c0 = arith.constant 0 : index
    %c0_0 = arith.constant 0 : index
    %0 = vector.load %arg1[%c0, %c0_0] : memref<8x8xf32, #tpu.memory_space<vmem>>, vector<8x8xf32>
    %1 = arith.truncf %0 : vector<8x8xf32> to vector<8x8xbf16>
    %c0_1 = arith.constant 0 : index
    %c0_2 = arith.constant 0 : index
    %2 = vector.load %arg2[%c0_1, %c0_2] : memref<8x128xbf16, #tpu.memory_space<vmem>>, vector<8x128xbf16>
    %cst = arith.constant dense<0.000000e+00> : vector<8x128xf32>
    %3 = tpu.matmul %1, %2, %cst {dimension_numbers = #tpu.dot_dimension_numbers<[1], [0], [0], [1], [0, 0, 1, 1], [], []>} : vector<8x8xbf16>, vector<8x128xbf16>, vector<8x128xf32> -> vector<8x128xf32>
    %c0_3 = arith.constant 0 : index
    %c0_4 = arith.constant 0 : index
    %4 = vector.load %arg3[%c0_3, %c0_4] : memref<1x128xf32, #tpu.memory_space<vmem>>, vector<1x128xf32>
    %5 = vector.broadcast %4 : vector<1x128xf32> to vector<8x128xf32>
    %6 = arith.addf %3, %5 : vector<8x128xf32>
    %cst_5 = arith.constant 0.000000e+00 : f32
    %7 = vector.broadcast %cst_5 : f32 to vector<8x128xf32>
    %8 = arith.maximumf %6, %7 : vector<8x128xf32>
    %9 = arith.truncf %8 : vector<8x128xf32> to vector<8x128xbf16>
    %c0_6 = arith.constant 0 : index
    %c0_7 = arith.constant 0 : index
    %10 = vector.load %arg4[%c0_6, %c0_7] : memref<128x128xbf16, #tpu.memory_space<vmem>>, vector<128x128xbf16>
    %cst_8 = arith.constant dense<0.000000e+00> : vector<8x128xf32>
    %11 = tpu.matmul %9, %10, %cst_8 {dimension_numbers = #tpu.dot_dimension_numbers<[1], [0], [0], [1], [0, 0, 1, 1], [], []>} : vector<8x128xbf16>, vector<128x128xbf16>, vector<8x128xf32> -> vector<8x128xf32>
    %c0_9 = arith.constant 0 : index
    %c0_10 = arith.constant 0 : index
    %12 = vector.load %arg5[%c0_9, %c0_10] : memref<1x128xf32, #tpu.memory_space<vmem>>, vector<1x128xf32>
    %13 = vector.broadcast %12 : vector<1x128xf32> to vector<8x128xf32>
    %14 = arith.addf %11, %13 : vector<8x128xf32>
    %cst_11 = arith.constant 0.000000e+00 : f32
    %15 = vector.broadcast %cst_11 : f32 to vector<8x128xf32>
    %16 = arith.maximumf %14, %15 : vector<8x128xf32>
    %17 = arith.truncf %16 : vector<8x128xf32> to vector<8x128xbf16>
    %c0_12 = arith.constant 0 : index
    %c0_13 = arith.constant 0 : index
    %18 = vector.load %arg6[%c0_12, %c0_13] : memref<128x4xbf16, #tpu.memory_space<vmem>>, vector<128x4xbf16>
    %cst_14 = arith.constant dense<0.000000e+00> : vector<8x4xf32>
    %19 = tpu.matmul %17, %18, %cst_14 {dimension_numbers = #tpu.dot_dimension_numbers<[1], [0], [0], [1], [0, 0, 1, 1], [], []>} : vector<8x128xbf16>, vector<128x4xbf16>, vector<8x4xf32> -> vector<8x4xf32>
    %c0_15 = arith.constant 0 : index
    %c0_16 = arith.constant 0 : index
    %20 = vector.load %arg7[%c0_15, %c0_16] : memref<1x4xf32, #tpu.memory_space<vmem>>, vector<1x4xf32>
    %21 = vector.broadcast %20 : vector<1x4xf32> to vector<8x4xf32>
    %22 = arith.addf %19, %21 : vector<8x4xf32>
    %c0_17 = arith.constant 0 : index
    %c0_18 = arith.constant 0 : index
    %23 = vector.load %arg8[%c0_17, %c0_18] : memref<8x4xf32, #tpu.memory_space<vmem>>, vector<8x4xf32>
    tpu.vector_store %arg8[%c0_17, %c0_18], %22 {strides = array<i32>} : memref<8x4xf32, #tpu.memory_space<vmem>>, vector<8x4xf32>,
    return
  }
  func.func @transform_0(%arg0: i32) -> (i32, i32) {
    %c0_i32 = arith.constant 0 : i32
    %c0_i32_0 = arith.constant 0 : i32
    return %arg0, %c0_i32 : i32, i32
  }
  func.func @transform_1(%arg0: i32) -> (i32, i32) {
    %c0_i32 = arith.constant 0 : i32
    %c0_i32_0 = arith.constant 0 : i32
    %c0_i32_1 = arith.constant 0 : i32
    return %c0_i32, %c0_i32_0 : i32, i32
  }
  func.func @transform_2(%arg0: i32) -> (i32, i32) {
    %c0_i32 = arith.constant 0 : i32
    %c0_i32_0 = arith.constant 0 : i32
    %c0_i32_1 = arith.constant 0 : i32
    return %c0_i32, %c0_i32_0 : i32, i32
  }
  func.func @transform_3(%arg0: i32) -> (i32, i32) {
    %c0_i32 = arith.constant 0 : i32
    %c0_i32_0 = arith.constant 0 : i32
    %c0_i32_1 = arith.constant 0 : i32
    return %c0_i32, %c0_i32_0 : i32, i32
  }
  func.func @transform_4(%arg0: i32) -> (i32, i32) {
    %c0_i32 = arith.constant 0 : i32
    %c0_i32_0 = arith.constant 0 : i32
    %c0_i32_1 = arith.constant 0 : i32
    return %c0_i32, %c0_i32_0 : i32, i32
  }
  func.func @transform_5(%arg0: i32) -> (i32, i32) {
    %c0_i32 = arith.constant 0 : i32
    %c0_i32_0 = arith.constant 0 : i32
    %c0_i32_1 = arith.constant 0 : i32
    return %c0_i32, %c0_i32_0 : i32, i32
  }
  func.func @transform_6(%arg0: i32) -> (i32, i32) {
    %c0_i32 = arith.constant 0 : i32
    %c0_i32_0 = arith.constant 0 : i32
    %c0_i32_1 = arith.constant 0 : i32
    return %c0_i32, %c0_i32_0 : i32, i32
  }
  func.func @transform_7(%arg0: i32) -> (i32, i32) {
    %c0_i32 = arith.constant 0 : i32
    %c0_i32_0 = arith.constant 0 : i32
    return %arg0, %c0_i32 : i32, i32
  }
}

</mosaic_0001>

<bundles_post_ra>
// kernel: tpu_custom_call.1
= control target key start
LH: loop header
LB: loop body
LE: loop exit
PB: predicated region body
PF: predicated region fallthrough
CT: control target
= control target key end

     0   :  { %vm41_vm0 = vcmask 1043456   ;;  %v421_v0 = vmov 0.0   ;;  %vm422_vm1 = vmmov 0   ;;  %vm37_vm2 = vcmask 64512   ;;  %s552_s1 = inlined_call_operand.vmem [shape: bf16[8,128], index: 1, kind: input, shape index: {}]   ;;  %s553_s0 = inlined_call_operand.vmem [shape: f32[8,8], index: 0, kind: input, shape index: {}]   ;;  %s554_s3 = inlined_call_operand.vmem [shape: bf16[128,128], index: 3, kind: input, shape index: {}]   ;;  %s555_s5 = inlined_call_operand.vmem [shape: bf16[128,4], index: 5, kind: input, shape index: {}]   ;;  %s556_s2 = inlined_call_operand.vmem [shape: f32[1,128], index: 2, kind: input, shape index: {}]   ;;  %s557_s4 = inlined_call_operand.vmem [shape: f32[1,128], index: 4, kind: input, shape index: {}]   ;;  %s558_s6 = inlined_call_operand.vmem [shape: f32[1,4], index: 6, kind: input, shape index: {}]   ;;  %s559_s7 = inlined_call_operand.vmem [shape: f32[8,4], index: 7, kind: output, shape index: {}]  }
   0x1   :  { %357 = vmatprep.subr.bf16.mxu0 %v421_v0  ;;  %v29_v1 = vld [vmem:[%s552_s1] sm:$0xf]  ;;  %359 = vmatprep.mubr.msk.bf16.mxu0 %vm422_vm1, %v421_v0  ;;  %v406_v6 = vld [vmem:[%s554_s3 + $0x8] sm:$0xff]   ;;  %v407_v7 = vld [vmem:[%s554_s3 + $0x10] sm:$0xff]   ;;  %vm311_vm3 = vcmask 31744  }
   0x2   :  { %v27_v2 = vld [vmem:[%s553_s0] sm:$0xff]  ;;  %v43_v3 = vsel %vm41_vm0, %v29_v1, 0  ;;  %363 = vmatprep.subr.bf16.mxu1 %v421_v0  ;;  %379 = vmatprep.mubr.msk.bf16.mxu1 %vm422_vm1, %v421_v0  ;;  %v408_v8 = vld [vmem:[%s554_s3 + $0x18] sm:$0xff]   ;;  %v410_v10 = vld [vmem:[%s554_s3 + $0x28] sm:$0xff]  }
   0x3   :  { %v28_v4 = vpack.c.bf16 %v27_v2, %v27_v2  ;;  %v405_v5 = vld [vmem:[%s554_s3] sm:$0xff]   ;;  %358 = vmatpush3.bf16.msra.mxu0 %v43_v3  ;;  %v411_v11 = vld [vmem:[%s554_s3 + $0x30] sm:$0xff]   ;;  %v412_v12 = vld [vmem:[%s554_s3 + $0x38] sm:$0xff]  }
   0x4   :  { %364 = vmatpush3.bf16.msra.mxu1 %v405_v5  ;;  %383 = vmatprep.subr.bf16.mxu0 %v421_v0  ;;  %v409_v9 = vld [vmem:[%s554_s3 + $0x20] sm:$0xff]   ;;  %v414_v14 = vld [vmem:[%s555_s5 + $0x8] sm:$0xff]   ;;  %v415_v15 = vld [vmem:[%s555_s5 + $0x10] sm:$0xff]  }
   0x5   :  { %365 = vmatprep.subr.bf16.mxu1 %v421_v0  ;;  %v413_v13 = vld [vmem:[%s555_s5] sm:$0xff]   ;;  %v416_v16 = vld [vmem:[%s555_s5 + $0x18] sm:$0xff]   ;;  %v418_v18 = vld [vmem:[%s555_s5 + $0x28] sm:$0xff]  }
   0x6   :  { %360 = vmatmul.mubr.msk.bf16.vlgmr.msra.gmra.mrb[0].mxu0 %vm37_vm2, %v28_v4  ;;  %v417_v17 = vld [vmem:[%s555_s5 + $0x20] sm:$0xff]   ;;  %v419_v27 = vld [vmem:[%s555_s5 + $0x30] sm:$0xff]   ;;  %v420_v28 = vld [vmem:[%s555_s5 + $0x38] sm:$0xff]  }
   0x7   :  { %399 = vmatprep.mubr.msk.bf16.mxu0 %vm422_vm1, %v421_v0  ;;  %384 = vmatpush3.bf16.msra.mxu0 %v413_v13  ;;  %v317_v19 = vld [vmem:[%s556_s2] ss:$0 sm:$0xff] }
   0x8   :  { %366 = vmatpush3.bf16.msra.mxu1 %v406_v6  ;;  %385 = vmatprep.subr.bf16.mxu0 %v421_v0  ;;  %v319_v29 = vld [vmem:[%s557_s4] ss:$0 sm:$0xff] }
   0x9   :  { %367 = vmatprep.subr.bf16.mxu1 %v421_v0  ;;  %v328_v37 = vld [vmem:[%s558_s6] ss:$0 sm:$0xff] }
   0xb   :  { %386 = vmatpush3.bf16.msra.mxu0 %v414_v14 }
   0xc   :  { %368 = vmatpush3.bf16.msra.mxu1 %v407_v7  ;;  %387 = vmatprep.subr.bf16.mxu0 %v421_v0 }
   0xd   :  { %369 = vmatprep.subr.bf16.mxu1 %v421_v0 }
   0xf   :  { %388 = vmatpush3.bf16.msra.mxu0 %v415_v15 }
  0x10   :  { %370 = vmatpush3.bf16.msra.mxu1 %v408_v8  ;;  %389 = vmatprep.subr.bf16.mxu0 %v421_v0 }
  0x11   :  { %371 = vmatprep.subr.bf16.mxu1 %v421_v0 }
  0x13   :  { %390 = vmatpush3.bf16.msra.mxu0 %v416_v16 }
  0x14   :  { %372 = vmatpush3.bf16.msra.mxu1 %v409_v9  ;;  %391 = vmatprep.subr.bf16.mxu0 %v421_v0 }
  0x15   :  { %373 = vmatprep.subr.bf16.mxu1 %v421_v0 }
  0x17   :  { %392 = vmatpush3.bf16.msra.mxu0 %v417_v17 }
  0x18   :  { %374 = vmatpush3.bf16.msra.mxu1 %v410_v10  ;;  %393 = vmatprep.subr.bf16.mxu0 %v421_v0 }
  0x19   :  { %375 = vmatprep.subr.bf16.mxu1 %v421_v0 }
  0x1b   :  { %394 = vmatpush3.bf16.msra.mxu0 %v418_v18 }
  0x1c   :  { %376 = vmatpush3.bf16.msra.mxu1 %v411_v11  ;;  %395 = vmatprep.subr.bf16.mxu0 %v421_v0 }
  0x1d   :  { %377 = vmatprep.subr.bf16.mxu1 %v421_v0 }
  0x1f   :  { %396 = vmatpush3.bf16.msra.mxu0 %v419_v27 }
  0x20   :  { %378 = vmatpush3.bf16.msra.mxu1 %v412_v12  ;;  %397 = vmatprep.subr.bf16.mxu0 %v421_v0 }
  0x23   :  { %398 = vmatpush3.bf16.msra.mxu0 %v420_v28 }
  0xd9   :  { %v79_v20 = vpop.f32.mrb[0].mxu0 }
  0xda   :  { %v80_v21 = vadd.f32 %v317_v19, %v79_v20  ;;  %v361_v22 = vpop.f32.mrb[1].mxu0 }
  0xdb   :  { %v82_v23 = vpop.f32.mrb[2].mxu0 }
  0xdc   :  { %v85_v24 = vmax.f32 %v80_v21, 0.0  ;;  %v362_v25 = vpop.f32.mrb[3].mxu0 }
  0xde   :  { %v86_v26 = vpack.c.bf16 %v85_v24, %v85_v24 }
  0xe0   :  { %380 = vmatmul.mubr.bf16.vlgmr.msra.gmra.mrb[0].mxu1 %v86_v26 }
 0x1b3   :  { %v192_v30 = vpop.f32.mrb[0].mxu1 }
 0x1b4   :  { %v193_v31 = vadd.f32 %v319_v29, %v192_v30  ;;  %v381_v32 = vpop.f32.mrb[1].mxu1 }
 0x1b5   :  { %v195_v33 = vpop.f32.mrb[2].mxu1 }
 0x1b6   :  { %v198_v34 = vmax.f32 %v193_v31, 0.0  ;;  %v382_v35 = vpop.f32.mrb[3].mxu1 }
 0x1b8   :  { %v199_v36 = vpack.c.bf16 %v198_v34, %v198_v34 }
 0x1ba   :  { %400 = vmatmul.mubr.bf16.vlgmr.msra.gmra.mrb[4].mxu0 %v199_v36 }
 0x28d   :  { %v305_v38 = vpop.f32.mrb[4].mxu0 }
 0x28e   :  { %v306_v39 = vadd.f32 %v328_v37, %v305_v38  ;;  %v401_v40 = vpop.f32.mrb[5].mxu0 }
 0x28f   :  { %v308_v41 = vpop.f32.mrb[6].mxu0 }
 0x290   :  { %312 = vst.msk [vmem:[%s559_s7] sm:$0xff] %vm311_vm3, %v306_v39  ;;  %v402_v42 = vpop.f32.mrb[7].mxu0 }

</bundles_post_ra>
